<compile_context>
chip_gen: v5e
topology: v5e:2x2
jax: 0.10.0
libtpu: 0.0.40
codegen_flags: <defaults>
</compile_context>

<pallas_src>
import math
import jax
import jax.numpy as jnp
from jax.experimental import pallas as pl
from jax.experimental.pallas import tpu as pltpu


# ----------------------------- Pallas kernel --------------------------------

def _conv_gn_relu_kernel(w_ref, p_ref, gamma_ref, beta_ref, o_ref):
    """Fused conv-as-matmul + GroupNorm(1 group) + affine + ReLU, one sample.

    w_ref:     (Cout, K)    matmul weight (bf16 or f32)
    p_ref:     (1, K, HW)   im2col patches for this sample (bf16 or f32)
    gamma_ref: (Cout, 1)    GroupNorm scale (f32)
    beta_ref:  (Cout, 1)    GroupNorm shift (f32)
    o_ref:     (1, Cout, HW) output (f32), NCHW-flat
    """
    eps = 1e-5  # PyTorch F.group_norm default

    p = p_ref[0]                                   # (K, HW)
    # MXU matmul with f32 accumulation; HW stays on the lane axis.
    y = jnp.dot(w_ref[...], p, preferred_element_type=jnp.float32)  # (Cout, HW)

    # GroupNorm with a single group == stats over all (Cout*HW) elements of
    # this sample.  One pass: mean and mean-of-squares.
    inv_cnt = 1.0 / (y.shape[0] * y.shape[1])
    mean = jnp.sum(y) * inv_cnt
    mean_sq = jnp.sum(y * y) * inv_cnt
    var = mean_sq - mean * mean
    inv_std = jax.lax.rsqrt(var + eps)

    # Per-channel affine: (Cout, 1) broadcasts across the lane axis.
    out = (y - mean) * inv_std * gamma_ref[...] + beta_ref[...]
    o_ref[0] = jnp.maximum(out, 0.0).astype(o_ref.dtype)


# ------------------------------- wrapper -------------------------------------

def _round_up(x, m):
    return ((x + m - 1) // m) * m


def conv2d_block_forward(x_nchw, conv_weight, gn_weight, gn_bias,
                         stride=1, padding=0, compute_dtype=jnp.bfloat16):
    """Forward pass of Conv2dBlock.

    x_nchw:      (N, Cin, H, W)       -- PyTorch NCHW convention
    conv_weight: (Cout, Cin, kh, kw)  -- PyTorch conv weight layout
    gn_weight:   (Cout,)
    gn_bias:     (Cout,)
    Returns (N, Cout, Ho, Wo) float32.
    """
    N, Cin, H, W = x_nchw.shape
    Cout, _, kh, kw = conv_weight.shape
    Ho = (H + 2 * padding - kh) // stride + 1
    Wo = (W + 2 * padding - kw) // stride + 1
    HW = Ho * Wo
    K = Cin * kh * kw

    # ---- glue: pad + im2col in (N, K, HW) layout (spatial on lanes) ---------
    x = x_nchw.astype(jnp.float32)
    xp = jnp.pad(x, ((0, 0), (0, 0), (padding, padding), (padding, padding)))
    cols = []
    for dy in range(kh):
        for dx in range(kw):
            cols.append(xp[:, :, dy:dy + Ho * stride:stride,
                              dx:dx + Wo * stride:stride])      # (N,Cin,Ho,Wo)
    # (N, Cin, kh*kw, Ho, Wo) -> (N, K, HW); K ordered (ci, dy, dx) to match
    # conv_weight.reshape(Cout, Cin*kh*kw).
    patches = jnp.stack(cols, axis=2).reshape(N, K, HW)
    w2 = conv_weight.reshape(Cout, K)

    # bf16 operands for the MXU (f32 accumulation inside the kernel).
    patches = patches.astype(compute_dtype)
    w2 = w2.astype(compute_dtype)
    gamma = gn_weight.reshape(Cout, 1).astype(jnp.float32)
    beta = gn_bias.reshape(Cout, 1).astype(jnp.float32)

    # ---- VMEM budget (v7x: 64 MiB physical, 32 MiB scoped default) ----------
    in_item = jnp.dtype(compute_dtype).itemsize
    sub = 32 // (8 * in_item)  # sublane packing factor
    est_block_bytes = (
        2 * _round_up(K, 8 * sub) * _round_up(HW, 128) * in_item        # patches (x2 buf)
        + _round_up(Cout, 8 * sub) * _round_up(K, 128) * in_item        # weight
        + 2 * _round_up(Cout, 8) * _round_up(HW, 128) * 4               # output (x2 buf)
        + 2 * _round_up(Cout, 8) * _round_up(HW, 128) * 4               # y + temps
    )
    assert est_block_bytes <= 24 * 1024 * 1024, (
        "per-sample block too large for v7x scoped VMEM; tile HW"
    )
    vmem_limit = int(min(max(4 * est_block_bytes, 16 * 1024 * 1024),
                         32 * 1024 * 1024))

    # ---- fused Pallas kernel: conv matmul + GroupNorm + affine + ReLU -------
    out_flat = pl.pallas_call(
        _conv_gn_relu_kernel,
        out_shape=jax.ShapeDtypeStruct((N, Cout, HW), jnp.float32),
        grid_spec=pltpu.PrefetchScalarGridSpec(
            num_scalar_prefetch=0,
            grid=(N,),
            in_specs=[
                pl.BlockSpec((Cout, K), lambda n: (0, 0)),      # weight
                pl.BlockSpec((1, K, HW), lambda n: (n, 0, 0)),  # patches
                pl.BlockSpec((Cout, 1), lambda n: (0, 0)),      # gamma
                pl.BlockSpec((Cout, 1), lambda n: (0, 0)),      # beta
            ],
            out_specs=pl.BlockSpec((1, Cout, HW), lambda n: (n, 0, 0)),
        ),
        compiler_params=pltpu.CompilerParams(
            dimension_semantics=("parallel",),   # batch shards across TCs (v7x)
            vmem_limit_bytes=vmem_limit),
    )(w2, patches, gamma, beta)

    # Output is already NCHW-flat: just fold HW back to (Ho, Wo).
    return out_flat.reshape(N, Cout, Ho, Wo)


# ------------------------------ reference -----------------------------------

def _reference(x_nchw, conv_weight, gn_weight, gn_bias, stride, padding):
    y = jax.lax.conv_general_dilated(
        x_nchw.astype(jnp.float32), conv_weight.astype(jnp.float32),
        window_strides=(stride, stride),
        padding=[(padding, padding), (padding, padding)],
        dimension_numbers=("NCHW", "OIHW", "NCHW"))
    N, C, Hh, Ww = y.shape
    yr = y.reshape(N, -1)
    mean = yr.mean(axis=1, keepdims=True)
    var = ((yr - mean) ** 2).mean(axis=1, keepdims=True)
    yn = ((yr - mean) / jnp.sqrt(var + 1e-5)).reshape(N, C, Hh, Ww)
    out = yn * gn_weight.reshape(1, C, 1, 1) + gn_bias.reshape(1, C, 1, 1)
    return jnp.maximum(out, 0.0)


# --------------------------------- main --------------------------------------

if __name__ == "__main__":
    # Shapes consistent with Conv2dBlock(in=4, out=8, k=3, stride=1, pad=1)
    N, Cin, H, W = 2, 4, 16, 16
    Cout, ksz, stride, padding = 8, 3, 1, 1

    key = jax.random.PRNGKey(0)
    kx, kw = jax.random.split(key)

    x = jax.random.normal(kx, (N, Cin, H, W), dtype=jnp.float32)

    # kaiming_uniform_(nonlinearity='relu'): bound = sqrt(2)*sqrt(3/fan_in)
    fan_in = Cin * ksz * ksz
    bound = math.sqrt(2.0) * math.sqrt(3.0 / fan_in)
    conv_weight = jax.random.uniform(
        kw, (Cout, Cin, ksz, ksz), minval=-bound, maxval=bound,
        dtype=jnp.float32)

    gn_weight = jnp.ones((Cout,), jnp.float32)   # nn.Parameter(torch.ones(out))
    gn_bias = jnp.zeros((Cout,), jnp.float32)    # nn.Parameter(torch.zeros(out))

    ref = jax.block_until_ready(
        _reference(x, conv_weight, gn_weight, gn_bias, stride, padding))

    # f32 matmul path: tight check against the f32 reference.
    out_f32 = jax.block_until_ready(conv2d_block_forward(
        x, conv_weight, gn_weight, gn_bias, stride=stride, padding=padding,
        compute_dtype=jnp.float32))
    assert out_f32.shape == (N, Cout, H, W), out_f32.shape
    assert jnp.allclose(out_f32, ref, atol=1e-4, rtol=1e-4), float(
        jnp.max(jnp.abs(out_f32 - ref)))

    # bf16 MXU fast path (the production config): looser tolerance vs f32 ref.
    out_bf16 = jax.block_until_ready(conv2d_block_forward(
        x, conv_weight, gn_weight, gn_bias, stride=stride, padding=padding,
        compute_dtype=jnp.bfloat16))
    assert out_bf16.shape == (N, Cout, H, W), out_bf16.shape
    assert jnp.allclose(out_bf16, ref, atol=2e-2, rtol=2e-2), float(
        jnp.max(jnp.abs(out_bf16 - ref)))

    print("KERNEL_OK")
</pallas_src>

<mosaic_0001>
module attributes {stable_mosaic.version = 11 : i64} {
  func.func @_conv_gn_relu_kernel(%arg0: i32, %arg1: memref<8x36xf32, #tpu.memory_space<vmem>>, %arg2: memref<1x36x256xf32, #tpu.memory_space<vmem>>, %arg3: memref<8x1xf32, #tpu.memory_space<vmem>>, %arg4: memref<8x1xf32, #tpu.memory_space<vmem>>, %arg5: memref<1x8x256xf32, #tpu.memory_space<vmem>>) attributes {dimension_semantics = [#tpu.dimension_semantics<parallel>], iteration_bounds = array<i64: 2>, scalar_prefetch = 0 : i64, scratch_operands = 0 : i64, tpu.core_type = #tpu.core_type<tc>, window_params = [{pipeline_mode = #tpu.pipeline_mode<synchronous>, transform_indices = @transform_0, window_bounds = array<i64: 8, 36>}, {transform_indices = @transform_1, window_bounds = array<i64: 1, 36, 256>}, {pipeline_mode = #tpu.pipeline_mode<synchronous>, transform_indices = @transform_2, window_bounds = array<i64: 8, 1>}, {pipeline_mode = #tpu.pipeline_mode<synchronous>, transform_indices = @transform_3, window_bounds = array<i64: 8, 1>}, {transform_indices = @transform_4, window_bounds = array<i64: 1, 8, 256>}]} {
    %c0 = arith.constant 0 : index
    %c0_0 = arith.constant 0 : index
    %c0_1 = arith.constant 0 : index
    %0 = vector.load %arg2[%c0, %c0_0, %c0_1] : memref<1x36x256xf32, #tpu.memory_space<vmem>>, vector<1x36x256xf32>
    %1 = vector.shape_cast %0 : vector<1x36x256xf32> to vector<36x256xf32>
    %c0_2 = arith.constant 0 : index
    %c0_3 = arith.constant 0 : index
    %2 = vector.load %arg1[%c0_2, %c0_3] : memref<8x36xf32, #tpu.memory_space<vmem>>, vector<8x36xf32>
    %cst = arith.constant dense<0.000000e+00> : vector<8x256xf32>
    %3 = tpu.matmul %2, %1, %cst {dimension_numbers = #tpu.dot_dimension_numbers<[1], [0], [0], [1], [0, 0, 1, 1], [], []>} : vector<8x36xf32>, vector<36x256xf32>, vector<8x256xf32> -> vector<8x256xf32>
    %4 = vector.shape_cast %3 : vector<8x256xf32> to vector<1x8x256xf32>
    %cst_4 = arith.constant dense<0.000000e+00> : vector<1xf32>
    %5 = vector.multi_reduction <add>, %4, %cst_4 [1, 2] : vector<1x8x256xf32> to vector<1xf32>
    %6 = vector.shape_cast %5 : vector<1xf32> to vector<1x1x1xf32>
    %7 = vector.extract %6[0, 0, 0] : f32 from vector<1x1x1xf32>
    %cst_5 = arith.constant 4.8828125E-4 : f32
    %8 = arith.mulf %7, %cst_5 : f32
    %9 = arith.mulf %3, %3 : vector<8x256xf32>
    %10 = vector.shape_cast %9 : vector<8x256xf32> to vector<1x8x256xf32>
    %cst_6 = arith.constant dense<0.000000e+00> : vector<1xf32>
    %11 = vector.multi_reduction <add>, %10, %cst_6 [1, 2] : vector<1x8x256xf32> to vector<1xf32>
    %12 = vector.shape_cast %11 : vector<1xf32> to vector<1x1x1xf32>
    %13 = vector.extract %12[0, 0, 0] : f32 from vector<1x1x1xf32>
    %cst_7 = arith.constant 4.8828125E-4 : f32
    %14 = arith.mulf %13, %cst_7 : f32
    %15 = arith.mulf %8, %8 : f32
    %16 = arith.subf %14, %15 : f32
    %cst_8 = arith.constant 9.99999974E-6 : f32
    %17 = arith.addf %16, %cst_8 : f32
    %18 = math.rsqrt %17 : f32
    %19 = vector.broadcast %8 : f32 to vector<8x256xf32>
    %20 = arith.subf %3, %19 : vector<8x256xf32>
    %21 = vector.broadcast %18 : f32 to vector<8x256xf32>
    %22 = arith.mulf %20, %21 : vector<8x256xf32>
    %c0_9 = arith.constant 0 : index
    %c0_10 = arith.constant 0 : index
    %23 = vector.load %arg3[%c0_9, %c0_10] : memref<8x1xf32, #tpu.memory_space<vmem>>, vector<8x1xf32>
    %24 = vector.broadcast %23 : vector<8x1xf32> to vector<8x256xf32>
    %25 = arith.mulf %22, %24 : vector<8x256xf32>
    %c0_11 = arith.constant 0 : index
    %c0_12 = arith.constant 0 : index
    %26 = vector.load %arg4[%c0_11, %c0_12] : memref<8x1xf32, #tpu.memory_space<vmem>>, vector<8x1xf32>
    %27 = vector.broadcast %26 : vector<8x1xf32> to vector<8x256xf32>
    %28 = arith.addf %25, %27 : vector<8x256xf32>
    %cst_13 = arith.constant 0.000000e+00 : f32
    %29 = vector.broadcast %cst_13 : f32 to vector<8x256xf32>
    %30 = arith.maximumf %28, %29 : vector<8x256xf32>
    %c0_14 = arith.constant 0 : index
    %c0_15 = arith.constant 0 : index
    %c0_16 = arith.constant 0 : index
    %31 = vector.load %arg5[%c0_14, %c0_15, %c0_16] : memref<1x8x256xf32, #tpu.memory_space<vmem>>, vector<1x8x256xf32>
    %32 = vector.shape_cast %31 : vector<1x8x256xf32> to vector<8x256xf32>
    %33 = vector.shape_cast %30 : vector<8x256xf32> to vector<1x8x256xf32>
    tpu.vector_store %arg5[%c0_14, %c0_15, %c0_16], %33 {strides = array<i32>} : memref<1x8x256xf32, #tpu.memory_space<vmem>>, vector<1x8x256xf32>,
    return
  }
  func.func @transform_0(%arg0: i32) -> (i32, i32) {
    %c0_i32 = arith.constant 0 : i32
    %c0_i32_0 = arith.constant 0 : i32
    %c0_i32_1 = arith.constant 0 : i32
    return %c0_i32, %c0_i32_0 : i32, i32
  }
  func.func @transform_1(%arg0: i32) -> (i32, i32, i32) {
    %c0_i32 = arith.constant 0 : i32
    %c0_i32_0 = arith.constant 0 : i32
    %c0_i32_1 = arith.constant 0 : i32
    return %arg0, %c0_i32, %c0_i32_0 : i32, i32, i32
  }
  func.func @transform_2(%arg0: i32) -> (i32, i32) {
    %c0_i32 = arith.constant 0 : i32
    %c0_i32_0 = arith.constant 0 : i32
    %c0_i32_1 = arith.constant 0 : i32
    return %c0_i32, %c0_i32_0 : i32, i32
  }
  func.func @transform_3(%arg0: i32) -> (i32, i32) {
    %c0_i32 = arith.constant 0 : i32
    %c0_i32_0 = arith.constant 0 : i32
    %c0_i32_1 = arith.constant 0 : i32
    return %c0_i32, %c0_i32_0 : i32, i32
  }
  func.func @transform_4(%arg0: i32) -> (i32, i32, i32) {
    %c0_i32 = arith.constant 0 : i32
    %c0_i32_0 = arith.constant 0 : i32
    %c0_i32_1 = arith.constant 0 : i32
    return %arg0, %c0_i32, %c0_i32_0 : i32, i32, i32
  }
}

</mosaic_0001>

<bundles_post_ra>
// kernel: tpu_custom_call.1
= control target key start
LH: loop header
LB: loop body
LE: loop exit
PB: predicated region body
PF: predicated region fallthrough
CT: control target
= control target key end

     0   :  { %9 = vsyncpa [#allocation3], 0  ;;  %s650_s0 = inlined_call_operand.vmem [shape: f32[8,36], index: 0, kind: input, shape index: {}]   ;;  %s651_s1 = inlined_call_operand.vmem [shape: f32[2,36,256], index: 1, kind: input, shape index: {}]   ;;  %s652_s2 = inlined_call_operand.vmem [shape: f32[8,1], index: 2, kind: input, shape index: {}]   ;;  %s653_s3 = inlined_call_operand.vmem [shape: f32[8,1], index: 3, kind: input, shape index: {}]   ;;  %s654_s4 = inlined_call_operand.hbm [shape: f32[2,8,256], index: 4, kind: output, shape index: {}]  }
   0x1   :  { %11 = vsyncpa [#allocation3 + $0x1], 0  ;;  %s556_s15 = smov 0   ;;  %s558_s16 = smov 0  }
   0x2   :  { %s560_s17 = smov 0   ;;  %s562_s18 = smov 0  }
   0x3 LB: > { %s577_s19 = sadd.s32 4294967295, %s528_s18   ;;  %s399_s20 = sadd.s32 4294967294, %s528_s18   ;;  %s528_s18 = sphi %s562_s18, %s660_s18   ;;  %s524_s17 = sphi %s560_s17, %s659_s17   ;;  %s520_s16 = sphi %s558_s16, %s658_s16   ;;  %s516_s15 = sphi %s556_s15, %s657_s15  }
   0x4   : > { %s581_s21 = sadd.s32 1, %s528_s18   ;;  %s113_s22 = sadd.s32 1, %s524_s17 }
   0x5   : > { %s110_s23 = ssub.s32 %s528_s18, %s581_s21  ;;  %p123_p0 = scmp.ne.s32.totalorder %s524_s17, %s520_s16 }
   0x6   : > { %p111_p1 = scmp.eq.s32.totalorder %s110_s23, 0  ;;  %p124_p2 = scmp.eq.s32.totalorder %s577_s19, 1 }
   0x7   : > { %p129_p3 = scmp.ne.s32.totalorder %s520_s16, %s516_s15  ;;  %p130_p4 = scmp.eq.s32.totalorder %s399_s20, 1 }
   0x8   : > { %s592_s24 = scalar_select %p111_p1, %s524_s17, %s113_s22  }
   0x9   : > { %p594_p5 = por %p124_p2, %p123_p0  ;;  %p598_p6 = por %p130_p4, %p129_p3 }
   0xa   : > { %p402_p7 = scmp.ge.s32.totalorder %s528_s18, 1  ;;  %p165_p8 = scmp.lt.s32.totalorder %s528_s18, 3 }
   0xc   : > { %p166_p9 = pnand %p402_p7, %p165_p8 }
   0xd   : > { %p191_p10 = scmp.lt.s32.totalorder (!%p166_p9), %s577_s19, 1 }
   0xe   : > { %169 = sbr.rel (%p166_p9) target bundleno = 436 (0x1b4), region = 36 }
  0x13   : > { %s192_s27 = scalar_select %p191_p10, %s577_s19, 1  ;;  %vm211_vm0 = vcmask 1043456   ;;  %v206_v10 = vld [vmem:[%s650_s0] sm:$0xff]  ;;  %vm207_vm1 = vcmask 293888   ;;  %v530_v18 = vmov 0  }
  0x14   : > { %v303_v17 = vld [vmem:[%s652_s2] sm:$0xff]  ;;  %462 = vset.pattern.permute.xlu1 %v530_v18  ;;  %463 = vset.pattern.permute.xlu0 %v530_v18 }
  0x15   : > { %s415_s28 = smul.u32 80, %s192_s27  ;;  %306 = vperm.xlu1 %462, %v303_v17   ;;  %v311_v19 = vld [vmem:[%s653_s3] sm:$0xff] }
  0x17   : > { %s195_s5 = scalar_lea.vmem %s651_s1, %s415_s28  ;;  %s188_s28 = sand.u32 1, %s520_s16  }
  0x18   : > { %v204_v0 = vld [vmem:[%s195_s5 + $0x40] sm:$0xf]  ;;  %v205_v1 = vld [vmem:[%s195_s5 + $0x48] sm:$0xf]  ;;  %v202_v2 = vld [vmem:[%s195_s5 + $0x30] sm:$0xff]  ;;  %s403_s29 = sshll.u32 %s188_s28, 4 }
  0x19   : > { %405 = vmatpush.msk.msra.mxu0 %vm211_vm0, %v204_v0  ;;  %407 = vmatpush.msk.msra.mxu1 %vm211_vm0, %v205_v1  ;;  %v203_v3 = vld [vmem:[%s195_s5 + $0x38] sm:$0xff]  ;;  %v200_v4 = vld [vmem:[%s195_s5 + $0x20] sm:$0xff]  ;;  %v201_v5 = vld [vmem:[%s195_s5 + $0x28] sm:$0xff]  ;;  %s190_s9 = scalar_lea.vmem [#allocation2], %s403_s29 }
  0x1a   : > { %v198_v6 = vld [vmem:[%s195_s5 + $0x10] sm:$0xff]  ;;  %v199_v7 = vld [vmem:[%s195_s5 + $0x18] sm:$0xff]  ;;  %v196_v8 = vld [vmem:[%s195_s5] sm:$0xff]  ;;  %s337_s10 = sshll.u32 %s190_s9, 4  ;;  %s338_s10 = int_to_ptr.vmem [resolvable:$true] %s337_s10 }
  0x1b   : > { %230 = vmatpush.msra.mxu0 %v202_v2  ;;  %250 = vmatpush.msra.mxu1 %v203_v3  ;;  %v197_v9 = vld [vmem:[%s195_s5 + $0x8] sm:$0xff]  ;;  %s414_s5 = sshll.u32 %s577_s19, 4  ;;  %s324_s19 = scalar_lea.sflag [#allocation3], %s188_s28 }
  0x1c   : > { %s335_s8 = scalar_lea.hbm %s654_s4, %s414_s5 }
  0x1d   : > { %231 = vmatpush.msra.mxu0 %v200_v4  ;;  %251 = vmatpush.msra.mxu1 %v201_v5  ;;  %s339_s11 = sshll.u32 %s335_s8, 4  ;;  %s340_s11 = int_to_ptr.hbm [resolvable:$true] %s339_s11 }
  0x1e   : > { %314 = vperm.xlu1 %462, %v311_v19  }
  0x1f   : > { %232 = vmatpush.msra.mxu0 %v198_v6  ;;  %252 = vmatpush.msra.mxu1 %v199_v7 }
  0x21   : > { %233 = vmatpush.msra.mxu0 %v196_v8  ;;  %253 = vmatpush.msra.mxu1 %v197_v9 }
  0x22   : > { %406 = vmatmul.msk.f32.vlgmr.msra.gmra.mxu0 %vm207_vm1, %v206_v10  ;;  %408 = vmatmul.msk.f32.vlgmr.msra.gmra.mxu1 %vm207_vm1, %v206_v10 }
  0x87   : > { %v307_v42 = vpop.permute.xlu1 %306 }
  0x90   : > { %v315_v51 = vpop.permute.xlu1 %314 }
  0x9f   : > { %v235_v11 = vpop.f32.mrf.mxu0  ;;  %v255_v12 = vpop.f32.mrf.mxu1 }
  0xa0   : > { %v258_v13 = vadd.f32 %v255_v12, %v235_v11  ;;  %v269_v14 = vmul.f32 %v235_v11, %v235_v11  ;;  %v270_v15 = vmul.f32 %v255_v12, %v255_v12 }
  0xa2   : > { %259 = vadd.xlane.f32.xlu0 %v258_v13  ;;  %v271_v16 = vadd.f32 %v270_v15, %v269_v14 }
  0xaa   : > { %272 = vadd.xlane.f32.xlu0 %v271_v16 }
 0x115   : > { %v260_v20 = vpop.xlane.xlu0 %259 }
 0x116   : > { %v261_v21 = vrot.slane %v260_v20, 4 }
 0x118   : > { %v262_v22 = vadd.f32 %v261_v21, %v260_v20 }
 0x11a   : > { %v263_v23 = vrot.slane %v262_v22, 2 }
 0x11c   : > { %v264_v24 = vadd.f32 %v263_v23, %v262_v22 }
 0x11d   : > { %v273_v25 = vpop.xlane.xlu0 %272 }
 0x11e   : > { %v274_v26 = vrot.slane %v273_v25, 4  ;;  %v265_v27 = vrot.slane %v264_v24, 1 }
 0x120   : > { %v275_v28 = vadd.f32 %v274_v26, %v273_v25  ;;  %v266_v29 = vadd.f32 %v265_v27, %v264_v24 }
 0x122   : > { %v276_v30 = vrot.slane %v275_v28, 2  ;;  %416 = vpush %v266_v29 }
 0x124   : > { %v277_v31 = vadd.f32 %v276_v30, %v275_v28 }
 0x126   : > { %v278_v32 = vrot.slane %v277_v31, 1 }
 0x128   : > { %v279_v33 = vadd.f32 %v278_v32, %v277_v31 }
 0x12a   : > { %418 = vpush %v279_v33 }
 0x153   : > { %s417_s12 = spop %416 }
 0x154   : > { %s268_s13 = smul.f32 0.00048828125, %s417_s12  ;;  %s480_s12 = sshra.s32 %s340_s11, 4  ;;  %s481_s12 = int_to_ptr.hbm [resolvable:$true] %s480_s12 }
 0x155   : > { %p487_p0 = scmp.lt.s32.totalorder %s481_s12, %s654_s4 }
 0x156   : > { %s282_s14 = smul.f32 %s268_s13, %s268_s13  ;;  %v297_v43 = vstv %s268_s13  ;;  %s482_s13 = scalar_lea.hbm %s481_s12, 16 }
 0x157   : > { %v298_v44 = vsub.f32 %v235_v11, %v297_v43  ;;  %v299_v45 = vsub.f32 %v255_v12, %v297_v43  ;;  %p483_p11 = scmp.ne.s32.totalorder %s481_s12, %s482_s13 }
 0x159   : > { %p484_p12 = pnand %p483_p11, %p594_p5 }
 0x15b   : > { %s419_s20 = spop %418  ;;  %p485_p13 = pneg %p484_p12 }
 0x15c   : > { %s281_s22 = smul.f32 0.00048828125, %s419_s20 }
 0x15e   : > { %s283_s23 = ssub.f32 %s281_s22, %s282_s14  ;;  %s486_s22 = scalar_lea.hbm %s654_s4, 32 }
 0x15f   : > { %p488_p1 = scmp.lt.s32.totalorder %s486_s22, %s482_s13 }
 0x160   : > { %s284_s27 = sadd.f32 1e-05, %s283_s23 }
 0x161   : > { %p489_p2 = por %p488_p1, %p487_p0 }
 0x162   : > { %v285_v34 = vstv %s284_s27 }
 0x163   : > { %464 = vrsqrt.f32 %v285_v34  ;;  %vm292_vm3 = vweird.f32 %v285_v34  ;;  %p490_p3 = pnand %p489_p2, %p485_p13 }
 0x169   : > { %v465_v35 = vpop.eup %464 }
 0x16a   : > { %v287_v36 = vmul.f32 %v465_v35, %v285_v34  ;;  %vm293_vm2 = vweird.f32 %v465_v35 }
 0x16b   : > { %vm294_vm4 = vmor %vm292_vm3, %vm293_vm2 }
 0x16c   : > { %v288_v37 = vmul.f32 %v465_v35, %v287_v36 }
 0x16e   : > { %v289_v38 = vmul.f32 0.5, %v288_v37 }
 0x170   : > { %v290_v39 = vsub.f32 1.5, %v289_v38 }
 0x172   : > { %v291_v40 = vmul.f32 %v465_v35, %v290_v39 }
 0x174   : > { %v295_v41 = vsel %vm294_vm4, %v465_v35, %v291_v40 }
 0x175   : > { %420 = vpush %v295_v41 }
 0x1a6   : > { %s421_s30 = spop %420 }
 0x1a7   : > { %v300_v46 = vstv %s421_s30 }
 0x1a8   : > { %v301_v47 = vmul.f32 %v300_v46, %v298_v44  ;;  %v302_v48 = vmul.f32 %v300_v46, %v299_v45 }
 0x1aa   : > { %v309_v49 = vmul.f32 %v307_v42, %v301_v47  ;;  %v310_v50 = vmul.f32 %v307_v42, %v302_v48 }
 0x1ac   : > { %v317_v52 = vadd.f32 %v315_v51, %v309_v49  ;;  %v318_v53 = vadd.f32 %v315_v51, %v310_v50 }
 0x1ae   : > { %v319_v54 = vmax.f32 %v317_v52, 0.0  ;;  %v320_v55 = vmax.f32 %v318_v53, 0.0 }
 0x1b0   : > { %321 = vst [vmem:[%s190_s9] sm:$0xff] %v319_v54 }
 0x1b1   : > { %322 = vst [vmem:[%s190_s9 + $0x8] sm:$0xff] %v320_v55 }
 0x1b2   : > { %493 = shalt.err (!%p490_p3)
}
 0x1b3   : > { %422 = dma.vmem_to_hbm [thread:$0]  (%p594_p5), %s338_s10, 256, %s340_s11, %s324_s19  }
 0x1b4 PF: > { %p428_p4 = scmp.ge.s32.totalorder %s528_s18, 2  ;;  %s351_s28 = sand.u32 1, %s516_s15  }
 0x1b5   : > { %s352_s29 = scalar_lea.sflag [#allocation3], %s351_s28 }
 0x1b6   : > { %p425_p7 = pnand %p428_p4, %p598_p6 }
 0x1b8   : > { %p426_p8 = pneg %p425_p7 }
 0x1ba   : > { %511 = dma.done.wait (%p426_p8), %s352_s29, 256  }
 0x1bb   : > { %513 = vsyncadd (%p426_p8), %s352_s29, 4294967040  ;;  %p14_p9 = scmp.ge.s32.totalorder %s581_s21, 4   ;;  %s657_s15 = smov %s520_s16 }
 0x1bc   : > { %s658_s16 = smov %s524_s17  ;;  %s659_s17 = smov %s592_s24 }
 0x1bd   : > { %s660_s18 = smov %s581_s21  ;;  %16 = sbr.rel (!%p14_p9) target bundleno = 3 (0x3), region = 71 }
 0x1c2   :  { %358 = vsyncpa [#allocation3], 1 }
 0x1c3   :  { %360 = vsyncpa [#allocation3 + $0x1], 1 }

</bundles_post_ra>
